<compile_context>
chip_gen: v5e
topology: v5e:2x2
jax: 0.10.0
libtpu: 0.0.40
codegen_flags: <defaults>
</compile_context>

<pallas_src>
import jax
import jax.numpy as jnp
from jax.experimental import pallas as pl
from jax.experimental.pallas import tpu as pltpu


def _round_up(x, m):
    return ((x + m - 1) // m) * m


_TILE_CANDIDATES = (2048, 1024, 512, 256, 128)


def _vmem_budget():
    """Returns (live-tile byte budget, vmem_limit_bytes) sized to this chip."""
    try:
        cap = int(pltpu.get_tpu_info().vmem_capacity_bytes)
    except Exception:
        cap = 64 << 20  # conservative default: assume the smallest (v7x)
    if cap >= (128 << 20):          # v4 / v5e / v6e: 128 MiB physical VMEM
        return 100 << 20, 112 << 20
    return 44 << 20, 56 << 20       # v7x: 64 MiB per TensorCore


def _pick_tiles_fullk(m, n, k, in_bytes, out_bytes, budget):
    """Largest roughly-square output tile with the FULL K dim in-block."""
    for t in _TILE_CANDIDATES:
        tm = t if m > t else m          # full-dim block => no padding needed
        tn = t if n > t else n
        live = (2 * tm * k + 2 * k * tn) * in_bytes      # double-buffered A, W
        live += 2 * tn * 4                               # bias (f32)
        live += 2 * tm * tn * out_bytes                  # double-buffered out
        if live <= budget:
            return tm, tn
    return None  # K too large for a single block -> use the k-split path


def _pick_tiles_ksplit(m, n, k, in_bytes, out_bytes, budget):
    tk = 512 if k > 512 else _round_up(k, 128)
    for t in _TILE_CANDIDATES:
        tm = t if m > t else m
        tn = t if n > t else n
        live = (2 * tm * tk + 2 * tk * tn) * in_bytes
        live += 2 * tn * 4
        live += 2 * tm * tn * out_bytes
        live += tm * tn * 4                               # f32 accumulator
        if live <= budget:
            return tm, tn, tk
    return (m if m < 128 else 128), (n if n < 128 else 128), tk


def _linear_kernel(x_ref, w_ref, b_ref, o_ref):
    # Full K resident in the block: single MXU matmul + bias, written once.
    acc = jnp.dot(x_ref[...], w_ref[...], preferred_element_type=jnp.float32)
    o_ref[...] = (acc + b_ref[...]).astype(o_ref.dtype)


def _linear_kernel_ksplit(x_ref, w_ref, b_ref, o_ref, acc_ref):
    # grid = (i_M, j_N, k_K); K (reduction) is the trailing 'arbitrary' axis.
    k = pl.program_id(2)

    @pl.when(k == 0)
    def _():
        acc_ref[...] = jnp.zeros_like(acc_ref)

    acc_ref[...] += jnp.dot(
        x_ref[...], w_ref[...], preferred_element_type=jnp.float32
    )

    @pl.when(k == pl.num_programs(2) - 1)
    def _():
        o_ref[...] = (acc_ref[...] + b_ref[...]).astype(o_ref.dtype)


def prepare_vanilla_params(weight, bias, *, compute_dtype=jnp.bfloat16):
    """One-time (parameter-load-time) transform of the nn.Linear parameters.

    weight: (ouc, 4*c) in nn.Linear layout; bias: (ouc,).
    Folds the PyTorch view->permute->view of the activation onto the weight:
    the activation path is then a free row-major reshape (feature f' = t*c+ch)
    and w_kn[f', n] == weight[n, ch*4 + t].
    """
    ouc, k_dim = weight.shape
    if k_dim % 4 != 0:
        raise ValueError("weight inner dim must be 4*c")
    c = k_dim // 4
    w_kn = weight.reshape(ouc, c, 4).transpose(2, 1, 0).reshape(k_dim, ouc)
    w_kn = w_kn.astype(compute_dtype)
    bias_f32 = bias.astype(jnp.float32).reshape(1, ouc)
    return w_kn, bias_f32


def vanilla_forward(x, w_kn, bias_f32, *, compute_dtype=jnp.bfloat16,
                    out_dtype=None):
    """x: (b, num_tokens, c); w_kn/bias_f32 from prepare_vanilla_params()."""
    b, num_tokens, c = x.shape
    if num_tokens % 4 != 0:
        raise ValueError("num_tokens must be divisible by 4")
    g = num_tokens // 4
    k_dim, ouc = w_kn.shape
    if k_dim != 4 * c:
        raise ValueError("prepared weight does not match input channel count")
    m = b * g
    if out_dtype is None:
        out_dtype = compute_dtype  # bf16 writeback: half the C-matrix bytes

    in_bytes = jnp.dtype(compute_dtype).itemsize
    out_bytes = jnp.dtype(out_dtype).itemsize
    budget, vmem_limit = _vmem_budget()

    # Activation: free row-major reshape, NO per-call permute of the big tensor.
    xg = x.reshape(m, k_dim).astype(compute_dtype)
    bias2d = bias_f32

    tiles = _pick_tiles_fullk(m, ouc, k_dim, in_bytes, out_bytes, budget)
    if tiles is not None:
        tm, tn = tiles
        m_pad = _round_up(m, tm)
        n_pad = _round_up(ouc, tn)
        if m_pad != m:
            xg = jnp.pad(xg, ((0, m_pad - m), (0, 0)))
        if n_pad != ouc:
            # Only triggers when ouc spans multiple tiles and is not a tile
            # multiple; in production fold this pad into prepare_vanilla_params.
            w_kn = jnp.pad(w_kn, ((0, 0), (0, n_pad - ouc)))
            bias2d = jnp.pad(bias2d, ((0, 0), (0, n_pad - ouc)))

        grid = (m_pad // tm, n_pad // tn)  # M leading -> balanced megacore split
        out = pl.pallas_call(
            _linear_kernel,
            out_shape=jax.ShapeDtypeStruct((m_pad, n_pad), out_dtype),
            grid=grid,
            in_specs=[
                pl.BlockSpec((tm, k_dim), lambda i, j: (i, 0)),   # activations
                pl.BlockSpec((k_dim, tn), lambda i, j: (0, j)),   # weight (K,N)
                pl.BlockSpec((1, tn), lambda i, j: (0, j)),       # bias (f32)
            ],
            out_specs=pl.BlockSpec((tm, tn), lambda i, j: (i, j)),
            compiler_params=pltpu.CompilerParams(
                dimension_semantics=("parallel", "parallel"),
                vmem_limit_bytes=vmem_limit,
            ),
        )(xg, w_kn, bias2d)
    else:
        # Fallback for very large K: split K as trailing 'arbitrary' axis with
        # an f32 VMEM accumulator (init at k==0, writeback at k==last).
        tm, tn, tk = _pick_tiles_ksplit(m, ouc, k_dim, in_bytes, out_bytes,
                                        budget)
        m_pad = _round_up(m, tm)
        n_pad = _round_up(ouc, tn)
        k_pad = _round_up(k_dim, tk)
        if (m_pad, k_pad) != (m, k_dim):
            xg = jnp.pad(xg, ((0, m_pad - m), (0, k_pad - k_dim)))
        if (k_pad, n_pad) != (k_dim, ouc):
            w_kn = jnp.pad(w_kn, ((0, k_pad - k_dim), (0, n_pad - ouc)))
        if n_pad != ouc:
            bias2d = jnp.pad(bias2d, ((0, 0), (0, n_pad - ouc)))

        grid = (m_pad // tm, n_pad // tn, k_pad // tk)
        out = pl.pallas_call(
            _linear_kernel_ksplit,
            out_shape=jax.ShapeDtypeStruct((m_pad, n_pad), out_dtype),
            grid=grid,
            in_specs=[
                pl.BlockSpec((tm, tk), lambda i, j, k: (i, k)),
                pl.BlockSpec((tk, tn), lambda i, j, k: (k, j)),
                pl.BlockSpec((1, tn), lambda i, j, k: (0, j)),
            ],
            out_specs=pl.BlockSpec((tm, tn), lambda i, j, k: (i, j)),
            scratch_shapes=[pltpu.VMEM((tm, tn), jnp.float32)],
            compiler_params=pltpu.CompilerParams(
                dimension_semantics=("parallel", "parallel", "arbitrary"),
                vmem_limit_bytes=vmem_limit,
            ),
        )(xg, w_kn, bias2d)

    out = out[:m, :ouc]
    return out.reshape(b, g, ouc)


def reference_forward(x, weight, bias):
    """Pure-JAX f32 reference with the exact PyTorch view/permute semantics."""
    b, num_tokens, c = x.shape
    g = num_tokens // 4
    xg = x.reshape(b, g, 4, c)
    xg = jnp.transpose(xg, (0, 1, 3, 2)).reshape(b, g, 4 * c)
    return jnp.einsum("bgk,nk->bgn", xg, weight) + bias


if __name__ == "__main__":
    # config.mm_hidden_size = 32, config.hidden_size = 64
    mm_hidden_size = 32
    hidden_size = 64
    batch = 2
    num_tokens = 8  # divisible by 4

    key = jax.random.PRNGKey(0)
    kx, kw, kb = jax.random.split(key, 3)
    x = jax.random.normal(kx, (batch, num_tokens, mm_hidden_size),
                          dtype=jnp.float32)
    # nn.Linear parameter shapes: (ouc, 4*inc), (ouc,)
    weight = jax.random.normal(
        kw, (hidden_size, mm_hidden_size * 4), dtype=jnp.float32) * 0.02
    bias = jax.random.normal(kb, (hidden_size,), dtype=jnp.float32) * 0.01

    # One-time parameter preparation (hoisted out of the forward path).
    w_kn, bias_f32 = prepare_vanilla_params(weight, bias)

    out = vanilla_forward(x, w_kn, bias_f32)
    out = jax.block_until_ready(out)

    ref = reference_forward(x, weight, bias)
    assert out.shape == (batch, num_tokens // 4, hidden_size), out.shape
    # bf16 operands / bf16 output vs f32 reference -> bf16-level tolerance.
    assert jnp.allclose(out.astype(jnp.float32), ref, atol=2e-2, rtol=2e-2), \
        "mismatch vs reference"

    print("KERNEL_OK")
</pallas_src>

<mosaic_0001>
module attributes {stable_mosaic.version = 11 : i64} {
  func.func @_linear_kernel(%arg0: i32, %arg1: i32, %arg2: memref<4x128xbf16, #tpu.memory_space<vmem>>, %arg3: memref<128x64xbf16, #tpu.memory_space<vmem>>, %arg4: memref<1x64xf32, #tpu.memory_space<vmem>>, %arg5: memref<4x64xbf16, #tpu.memory_space<vmem>>) attributes {dimension_semantics = [#tpu.dimension_semantics<parallel>, #tpu.dimension_semantics<parallel>], iteration_bounds = array<i64: 1, 1>, scalar_prefetch = 0 : i64, scratch_operands = 0 : i64, tpu.core_type = #tpu.core_type<tc>, window_params = [{transform_indices = @transform_0, window_bounds = array<i64: 4, 128>}, {transform_indices = @transform_1, window_bounds = array<i64: 128, 64>}, {transform_indices = @transform_2, window_bounds = array<i64: 1, 64>}, {transform_indices = @transform_3, window_bounds = array<i64: 4, 64>}]} {
    %c0 = arith.constant 0 : index
    %c0_0 = arith.constant 0 : index
    %0 = vector.load %arg2[%c0, %c0_0] : memref<4x128xbf16, #tpu.memory_space<vmem>>, vector<4x128xbf16>
    %c0_1 = arith.constant 0 : index
    %c0_2 = arith.constant 0 : index
    %1 = vector.load %arg3[%c0_1, %c0_2] : memref<128x64xbf16, #tpu.memory_space<vmem>>, vector<128x64xbf16>
    %cst = arith.constant dense<0.000000e+00> : vector<4x64xf32>
    %2 = tpu.matmul %0, %1, %cst {dimension_numbers = #tpu.dot_dimension_numbers<[1], [0], [0], [1], [0, 0, 1, 1], [], []>} : vector<4x128xbf16>, vector<128x64xbf16>, vector<4x64xf32> -> vector<4x64xf32>
    %c0_3 = arith.constant 0 : index
    %c0_4 = arith.constant 0 : index
    %3 = vector.load %arg4[%c0_3, %c0_4] : memref<1x64xf32, #tpu.memory_space<vmem>>, vector<1x64xf32>
    %4 = vector.broadcast %3 : vector<1x64xf32> to vector<4x64xf32>
    %5 = arith.addf %2, %4 : vector<4x64xf32>
    %6 = arith.truncf %5 : vector<4x64xf32> to vector<4x64xbf16>
    %c0_5 = arith.constant 0 : index
    %c0_6 = arith.constant 0 : index
    %7 = vector.load %arg5[%c0_5, %c0_6] : memref<4x64xbf16, #tpu.memory_space<vmem>>, vector<4x64xbf16>
    tpu.vector_store %arg5[%c0_5, %c0_6], %6 {strides = array<i32>} : memref<4x64xbf16, #tpu.memory_space<vmem>>, vector<4x64xbf16>,
    return
  }
  func.func @transform_0(%arg0: i32, %arg1: i32) -> (i32, i32) {
    %c0_i32 = arith.constant 0 : i32
    %c0_i32_0 = arith.constant 0 : i32
    return %arg0, %c0_i32 : i32, i32
  }
  func.func @transform_1(%arg0: i32, %arg1: i32) -> (i32, i32) {
    %c0_i32 = arith.constant 0 : i32
    %c0_i32_0 = arith.constant 0 : i32
    return %c0_i32, %arg1 : i32, i32
  }
  func.func @transform_2(%arg0: i32, %arg1: i32) -> (i32, i32) {
    %c0_i32 = arith.constant 0 : i32
    %c0_i32_0 = arith.constant 0 : i32
    return %c0_i32, %arg1 : i32, i32
  }
  func.func @transform_3(%arg0: i32, %arg1: i32) -> (i32, i32) {
    %c0_i32 = arith.constant 0 : i32
    return %arg0, %arg1 : i32, i32
  }
}

</mosaic_0001>

<bundles_post_ra>
// kernel: tpu_custom_call.1
= control target key start
LH: loop header
LB: loop body
LE: loop exit
PB: predicated region body
PF: predicated region fallthrough
CT: control target
= control target key end

     0   :  { %s238_s0 = inlined_call_operand.vmem [shape: bf16[4,128], index: 0, kind: input, shape index: {}]   ;;  %s239_s1 = inlined_call_operand.vmem [shape: bf16[128,64], index: 1, kind: input, shape index: {}]   ;;  %s240_s2 = inlined_call_operand.vmem [shape: f32[1,64], index: 2, kind: input, shape index: {}]   ;;  %s241_s3 = inlined_call_operand.hbm [shape: bf16[4,64], index: 3, kind: output, shape index: {}]  }
   0x1   :  { %v155_v0 = vld [vmem:[%s239_s1 + $0x38] sm:$0xff]  ;;  %v154_v1 = vld [vmem:[%s239_s1 + $0x30] sm:$0xff] }
   0x2   :  { %84 = vmatpush.bf16.msra.mxu0 %v155_v0 }
   0x3   :  { %8 = vsyncpa [#allocation3], 0  ;;  %v153_v2 = vld [vmem:[%s239_s1 + $0x28] sm:$0xff]  ;;  %v152_v3 = vld [vmem:[%s239_s1 + $0x20] sm:$0xff]  ;;  %s184_s5 = smov [#allocation2]   ;;  %s107_s9 = sshll.u32 %s241_s3, 4  ;;  %s108_s9 = int_to_ptr.hbm [resolvable:$true] %s107_s9 }
   0x4   :  { %v151_v4 = vld [vmem:[%s239_s1 + $0x18] sm:$0xff]  ;;  %v150_v5 = vld [vmem:[%s239_s1 + $0x10] sm:$0xff]  ;;  %v149_v6 = vld [vmem:[%s239_s1 + $0x8] sm:$0xff]  ;;  %s105_s6 = sshll.u32 %s184_s5, 4  ;;  %vm98_vm0 = vcmask 517120   ;;  %s106_s6 = int_to_ptr.vmem [resolvable:$true] %s105_s6 }
   0x5   :  { %v148_v7 = vld [vmem:[%s239_s1] sm:$0xff] }
   0x6   :  { %85 = vmatpush.bf16.msra.mxu0 %v154_v1  ;;  %v15_v8 = vld [vmem:[%s238_s0] sm:$0x3] }
   0x7   :  { %v157_v9 = vld [vmem:[%s240_s2] ss:$0 sm:$0xff] }
   0xa   :  { %86 = vmatpush.bf16.msra.mxu0 %v153_v2 }
   0xe   :  { %87 = vmatpush.bf16.msra.mxu0 %v152_v3 }
  0x12   :  { %88 = vmatpush.bf16.msra.mxu0 %v151_v4 }
  0x16   :  { %89 = vmatpush.bf16.msra.mxu0 %v150_v5 }
  0x1a   :  { %90 = vmatpush.bf16.msra.mxu0 %v149_v6 }
  0x1e   :  { %91 = vmatpush.bf16.msra.mxu0 %v148_v7 }
  0x21   :  { %92 = vmatmul.bf16.vlgmr.msra.gmra.mxu0 %v15_v8 }
  0x9e   :  { %v93_v10 = vpop.f32.mrf.mxu0 }
  0x9f   :  { %v94_v11 = vadd.f32 %v157_v9, %v93_v10 }
  0xa1   :  { %v97_v12 = vpack.c.bf16 %v94_v11, %v94_v11 }
  0xa3   :  { %99 = vst.msk [vmem:[#allocation2] sm:$0x3] %vm98_vm0, %v97_v12 }
  0xa4   :  { %110 = dma.vmem_to_hbm [thread:$0]  %s106_s6, 32, %s108_s9, [#allocation3]  }
  0xa6   :  { %v95_v13 = vpop.f32.mrf.mxu0 }
  0xa7   :  { %182 = dma.done.wait [#allocation3], 32  }
  0xa8   :  { %183 = vsyncadd [#allocation3], 4294967264 }
  0xa9   :  { %115 = vsyncpa [#allocation3], 1 }

</bundles_post_ra>
